<compile_context>
chip_gen: v7x
topology: tpu7x:2x2x1
jax: 0.10.0
libtpu: 0.0.40
codegen_flags: <defaults>
</compile_context>

<pallas_src>
import functools

import jax
import jax.numpy as jnp
from jax.experimental import pallas as pl
from jax.experimental.pallas import tpu as pltpu

EPS = 1e-5
_LANE = 128

# Per-x-block f32 byte budget.  4 MiB keeps the pass-2 pipeline footprint
# (double-buffered x + y + beta plus in-kernel f32 temporaries) comfortably
# under the 48 MiB scoped-VMEM limit requested below, which itself stays under
# v7x's 64 MiB physical VMEM (v5e/v6e have 128 MiB physical).
_BLOCK_BUDGET_BYTES = 4 * 1024 * 1024
_VMEM_LIMIT_BYTES = 48 * 1024 * 1024


# ----------------------------------------------------------------------------
# Pass 1: per-grid-step partial sum / sum-of-squares (fully parallel)
# ----------------------------------------------------------------------------
def _stats_kernel(x_ref, sum_ref, sq_ref, *, hw, hw_tile, mask_hw):
    x = x_ref[...].astype(jnp.float32)                      # (TN, C, THW)
    if mask_hw:
        # Last hw block overhangs HW: zero the padded lanes so they do not
        # corrupt the channel sums (Pallas does not zero OOB block contents).
        hi = pl.program_id(1)
        lane = jax.lax.broadcasted_iota(jnp.int32, x.shape, 2)
        x = jnp.where(lane < (hw - hi * hw_tile), x, 0.0)
    sum_ref[...] = jnp.sum(x, axis=(0, 2))[None, None, :]   # (1, 1, C)
    sq_ref[...] = jnp.sum(x * x, axis=(0, 2))[None, None, :]


# ----------------------------------------------------------------------------
# Pass 2: normalize  y = x * scale + (beta + shift)
#   scale = gamma * rsqrt(var + eps),  shift = -mu * scale   (precomputed)
# ----------------------------------------------------------------------------
def _norm_kernel(x_ref, scale_ref, shift_ref, beta_ref, y_ref):
    x = x_ref[...].astype(jnp.float32)                      # (TN, C, THW)
    scale = scale_ref[...][None]                            # (1, C, 1) f32
    shift = shift_ref[...][None]                            # (1, C, 1) f32
    b = beta_ref[...].astype(jnp.float32)[None] + shift     # (1, C, THW)
    y_ref[...] = (x * scale + b).astype(y_ref.dtype)


# ----------------------------------------------------------------------------
# Tile heuristics (budget-coupled; portable across v5e / v6e / v7x)
# ----------------------------------------------------------------------------
def _pick_tiles(n, c, hw, budget_bytes=_BLOCK_BUDGET_BYTES):
    """Choose (n_tile, hw_tile, n_blocks, hw_blocks) with an f32 x block of
    roughly <= budget_bytes.  hw_tile is the full HW (always legal) when it
    fits, otherwise the largest multiple of 128 within the per-channel budget
    (the last hw block is then masked in the stats pass)."""
    max_lanes = max(_LANE, budget_bytes // (4 * c))
    if hw <= max_lanes:
        hw_tile = hw                          # full last dim: always legal
    else:
        hw_tile = max(_LANE, (max_lanes // _LANE) * _LANE)
    hw_blocks = pl.cdiv(hw, hw_tile)

    per_n = 4 * c * hw_tile                   # f32 bytes of one n-row block
    n_tile = 1
    for d in range(min(n, max(1, budget_bytes // per_n)), 0, -1):
        if n % d == 0 and d * per_n <= budget_bytes:
            n_tile = d
            break
    return n_tile, hw_tile, n // n_tile, hw_blocks


# ----------------------------------------------------------------------------
# Wrapper
# ----------------------------------------------------------------------------
@jax.jit
def lazy_batchnorm2d(x, gamma, beta):
    """x: (N, C, H, W); gamma: (C,); beta: (C, H, W).

    Returns y (N, C, H, W), mu (C,), var (C,) — mu/var are what the PyTorch
    module appends to EPList/VarPList in the training branch.
    """
    N, C, H, W = x.shape
    HW = H * W
    L = N * HW

    # Free, contiguous reshapes only — no transposes, no dtype materialization.
    x3 = x.reshape(N, C, HW)
    beta2 = beta.reshape(C, HW)               # native dtype; cast in-kernel

    n_tile, hw_tile, n_blocks, hw_blocks = _pick_tiles(N, C, HW)
    steps = n_blocks * hw_blocks
    mask_hw = (HW % hw_tile) != 0

    cparams = pltpu.CompilerParams(
        dimension_semantics=("parallel", "parallel"),
        vmem_limit_bytes=_VMEM_LIMIT_BYTES)

    # ---- pass 1: per-block partial sums (megacore-parallel) -----------------
    sums, sqs = pl.pallas_call(
        functools.partial(_stats_kernel, hw=HW, hw_tile=hw_tile, mask_hw=mask_hw),
        out_shape=(jax.ShapeDtypeStruct((steps, 1, C), jnp.float32),
                   jax.ShapeDtypeStruct((steps, 1, C), jnp.float32)),
        grid=(n_blocks, hw_blocks),
        in_specs=[pl.BlockSpec((n_tile, C, hw_tile), lambda ni, hi: (ni, 0, hi))],
        out_specs=(
            pl.BlockSpec((1, 1, C), lambda ni, hi: (ni * hw_blocks + hi, 0, 0)),
            pl.BlockSpec((1, 1, C), lambda ni, hi: (ni * hw_blocks + hi, 0, 0)),
        ),
        compiler_params=cparams,
    )(x3)

    # ---- tiny wrapper finalize: hierarchical (count, mean, M2) merge --------
    # Per-block moments are merged Chan-style, which is exactly equal in exact
    # arithmetic to E[x^2]-E[x]^2 but far less prone to cancellation.
    valid_hw = [min(hw_tile, HW - hi * hw_tile) for hi in range(hw_blocks)]
    counts = jnp.asarray(
        [float(n_tile * v) for _ in range(n_blocks) for v in valid_hw],
        dtype=jnp.float32)[:, None]                                   # (steps, 1)

    s_b = sums.reshape(steps, C)
    q_b = sqs.reshape(steps, C)
    m_b = s_b / counts                                                # block means
    mean = jnp.sum(s_b, axis=0) / jnp.float32(L)                      # (C,)
    m2 = (jnp.sum(q_b - counts * m_b * m_b, axis=0)
          + jnp.sum(counts * (m_b - mean) ** 2, axis=0))
    # torch.var default is unbiased (correction=1) -> divide by L-1.
    # (L == 1 gives inf/nan at runtime, same as torch.var.)
    var = m2 / jnp.float32(L - 1)

    gamma32 = gamma.astype(jnp.float32)
    scale = gamma32 * jax.lax.rsqrt(var + jnp.float32(EPS))           # (C,)
    shift = -mean * scale                                             # (C,)
    scale_c1 = scale.reshape(C, 1)
    shift_c1 = shift.reshape(C, 1)

    # ---- pass 2: normalize (pure x-in / y-out stream) ------------------------
    # Grid order (hw outer, n inner) so each (C, hw_tile) beta block is reused
    # across the whole inner N loop; scale/shift stay VMEM-resident.
    y3 = pl.pallas_call(
        _norm_kernel,
        out_shape=jax.ShapeDtypeStruct((N, C, HW), x.dtype),
        grid=(hw_blocks, n_blocks),
        in_specs=[
            pl.BlockSpec((n_tile, C, hw_tile), lambda hi, ni: (ni, 0, hi)),
            pl.BlockSpec((C, 1), lambda hi, ni: (0, 0)),
            pl.BlockSpec((C, 1), lambda hi, ni: (0, 0)),
            pl.BlockSpec((C, hw_tile), lambda hi, ni: (0, hi)),
        ],
        out_specs=pl.BlockSpec((n_tile, C, hw_tile), lambda hi, ni: (ni, 0, hi)),
        compiler_params=cparams,
    )(x3, scale_c1, shift_c1, beta2)

    y = y3.reshape(N, C, H, W)
    return y, mean, var


# ----------------------------------------------------------------------------
# Pure-JAX reference of the torch forward (training branch)
# ----------------------------------------------------------------------------
def _reference(x, gamma, beta):
    N, C, H, W = x.shape
    xr = jnp.transpose(x, (1, 0, 2, 3)).reshape(C, -1)
    mu = jnp.mean(xr, axis=1)
    var = jnp.var(xr, axis=1, ddof=1)
    z = (x - mu[None, :, None, None]) / jnp.sqrt(var[None, :, None, None] + EPS)
    y = gamma[None, :, None, None] * z + beta[None, :, :, :]
    return y, mu, var


if __name__ == "__main__":
    key = jax.random.PRNGKey(0)
    kx, kg = jax.random.split(key)

    N, C, H, W = 2, 4, 16, 16
    x = jax.random.normal(kx, (N, C, H, W), dtype=jnp.float32)

    # Deterministic "lazyInit": gamma ~ U(0,1) of shape (C,), beta = zeros (C,H,W)
    gamma = jax.random.uniform(kg, (C,), dtype=jnp.float32)
    beta = jnp.zeros((C, H, W), dtype=jnp.float32)

    y, mu, var = lazy_batchnorm2d(x, gamma, beta)
    jax.block_until_ready((y, mu, var))

    y_ref, mu_ref, var_ref = _reference(x, gamma, beta)
    assert jnp.allclose(y, y_ref, atol=1e-4, rtol=1e-4)
    assert jnp.allclose(mu, mu_ref, atol=1e-5, rtol=1e-5)
    assert jnp.allclose(var, var_ref, atol=1e-4, rtol=1e-4)

    # TODO(synk): inference branch uses bin.AP2 (power-of-2 weight quantization
    # from an external module) and frozen running stats (frozeParameters,
    # host-side list accumulation); not implemented here.
    print("KERNEL_OK")
</pallas_src>

<mosaic_0001>
module attributes {stable_mosaic.version = 11 : i64} {
  func.func @_stats_kernel(%arg0: i32, %arg1: i32, %arg2: memref<2x4x256xf32, #tpu.memory_space<vmem>>, %arg3: memref<1x1x4xf32, #tpu.memory_space<vmem>>, %arg4: memref<1x1x4xf32, #tpu.memory_space<vmem>>) attributes {dimension_semantics = [#tpu.dimension_semantics<parallel>, #tpu.dimension_semantics<parallel>], iteration_bounds = array<i64: 1, 1>, scalar_prefetch = 0 : i64, scratch_operands = 0 : i64, tpu.core_type = #tpu.core_type<tc>, window_params = [{transform_indices = @transform_0, window_bounds = array<i64: 2, 4, 256>}, {transform_indices = @transform_1, window_bounds = array<i64: 1, 1, 4>}, {transform_indices = @transform_2, window_bounds = array<i64: 1, 1, 4>}]} {
    %c0 = arith.constant 0 : index
    %c0_0 = arith.constant 0 : index
    %c0_1 = arith.constant 0 : index
    %0 = vector.load %arg2[%c0, %c0_0, %c0_1] : memref<2x4x256xf32, #tpu.memory_space<vmem>>, vector<2x4x256xf32>
    %cst = arith.constant dense<0.000000e+00> : vector<4xf32>
    %1 = vector.multi_reduction <add>, %0, %cst [0, 2] : vector<2x4x256xf32> to vector<4xf32>
    %2 = vector.shape_cast %1 : vector<4xf32> to vector<1x1x4xf32>
    %c0_2 = arith.constant 0 : index
    %c0_3 = arith.constant 0 : index
    %c0_4 = arith.constant 0 : index
    %3 = vector.load %arg3[%c0_2, %c0_3, %c0_4] : memref<1x1x4xf32, #tpu.memory_space<vmem>>, vector<1x1x4xf32>
    tpu.vector_store %arg3[%c0_2, %c0_3, %c0_4], %2 {strides = array<i32>} : memref<1x1x4xf32, #tpu.memory_space<vmem>>, vector<1x1x4xf32>,
    %4 = arith.mulf %0, %0 : vector<2x4x256xf32>
    %cst_5 = arith.constant dense<0.000000e+00> : vector<4xf32>
    %5 = vector.multi_reduction <add>, %4, %cst_5 [0, 2] : vector<2x4x256xf32> to vector<4xf32>
    %6 = vector.shape_cast %5 : vector<4xf32> to vector<1x1x4xf32>
    %c0_6 = arith.constant 0 : index
    %c0_7 = arith.constant 0 : index
    %c0_8 = arith.constant 0 : index
    %7 = vector.load %arg4[%c0_6, %c0_7, %c0_8] : memref<1x1x4xf32, #tpu.memory_space<vmem>>, vector<1x1x4xf32>
    tpu.vector_store %arg4[%c0_6, %c0_7, %c0_8], %6 {strides = array<i32>} : memref<1x1x4xf32, #tpu.memory_space<vmem>>, vector<1x1x4xf32>,
    return
  }
  func.func @transform_0(%arg0: i32, %arg1: i32) -> (i32, i32, i32) {
    %c0_i32 = arith.constant 0 : i32
    %c0_i32_0 = arith.constant 0 : i32
    return %arg0, %c0_i32, %arg1 : i32, i32, i32
  }
  func.func @transform_1(%arg0: i32, %arg1: i32) -> (i32, i32, i32) {
    %c1_i32 = arith.constant 1 : i32
    %0 = arith.muli %arg0, %c1_i32 : i32
    %1 = arith.addi %0, %arg1 : i32
    %c0_i32 = arith.constant 0 : i32
    %c0_i32_0 = arith.constant 0 : i32
    %c0_i32_1 = arith.constant 0 : i32
    return %1, %c0_i32, %c0_i32_0 : i32, i32, i32
  }
  func.func @transform_2(%arg0: i32, %arg1: i32) -> (i32, i32, i32) {
    %c1_i32 = arith.constant 1 : i32
    %0 = arith.muli %arg0, %c1_i32 : i32
    %1 = arith.addi %0, %arg1 : i32
    %c0_i32 = arith.constant 0 : i32
    %c0_i32_0 = arith.constant 0 : i32
    %c0_i32_1 = arith.constant 0 : i32
    return %1, %c0_i32, %c0_i32_0 : i32, i32, i32
  }
}

module attributes {stable_mosaic.version = 11 : i64} {
  func.func @_norm_kernel(%arg0: i32, %arg1: i32, %arg2: memref<2x4x256xf32, #tpu.memory_space<vmem>>, %arg3: memref<4x1xf32, #tpu.memory_space<vmem>>, %arg4: memref<4x1xf32, #tpu.memory_space<vmem>>, %arg5: memref<4x256xf32, #tpu.memory_space<vmem>>, %arg6: memref<2x4x256xf32, #tpu.memory_space<vmem>>) attributes {dimension_semantics = [#tpu.dimension_semantics<parallel>, #tpu.dimension_semantics<parallel>], iteration_bounds = array<i64: 1, 1>, scalar_prefetch = 0 : i64, scratch_operands = 0 : i64, tpu.core_type = #tpu.core_type<tc>, window_params = [{transform_indices = @transform_0, window_bounds = array<i64: 2, 4, 256>}, {pipeline_mode = #tpu.pipeline_mode<synchronous>, transform_indices = @transform_1, window_bounds = array<i64: 4, 1>}, {pipeline_mode = #tpu.pipeline_mode<synchronous>, transform_indices = @transform_2, window_bounds = array<i64: 4, 1>}, {transform_indices = @transform_3, window_bounds = array<i64: 4, 256>}, {transform_indices = @transform_4, window_bounds = array<i64: 2, 4, 256>}]} {
    %c0 = arith.constant 0 : index
    %c0_0 = arith.constant 0 : index
    %c0_1 = arith.constant 0 : index
    %0 = vector.load %arg2[%c0, %c0_0, %c0_1] : memref<2x4x256xf32, #tpu.memory_space<vmem>>, vector<2x4x256xf32>
    %c0_2 = arith.constant 0 : index
    %c0_3 = arith.constant 0 : index
    %1 = vector.load %arg3[%c0_2, %c0_3] : memref<4x1xf32, #tpu.memory_space<vmem>>, vector<4x1xf32>
    %2 = vector.shape_cast %1 : vector<4x1xf32> to vector<1x4x1xf32>
    %c0_4 = arith.constant 0 : index
    %c0_5 = arith.constant 0 : index
    %3 = vector.load %arg4[%c0_4, %c0_5] : memref<4x1xf32, #tpu.memory_space<vmem>>, vector<4x1xf32>
    %4 = vector.shape_cast %3 : vector<4x1xf32> to vector<1x4x1xf32>
    %c0_6 = arith.constant 0 : index
    %c0_7 = arith.constant 0 : index
    %5 = vector.load %arg5[%c0_6, %c0_7] : memref<4x256xf32, #tpu.memory_space<vmem>>, vector<4x256xf32>
    %6 = vector.shape_cast %5 : vector<4x256xf32> to vector<1x4x256xf32>
    %7 = vector.broadcast %4 : vector<1x4x1xf32> to vector<1x4x256xf32>
    %8 = arith.addf %6, %7 : vector<1x4x256xf32>
    %9 = vector.broadcast %2 : vector<1x4x1xf32> to vector<2x4x256xf32>
    %10 = arith.mulf %0, %9 : vector<2x4x256xf32>
    %11 = vector.broadcast %8 : vector<1x4x256xf32> to vector<2x4x256xf32>
    %12 = arith.addf %10, %11 : vector<2x4x256xf32>
    %c0_8 = arith.constant 0 : index
    %c0_9 = arith.constant 0 : index
    %c0_10 = arith.constant 0 : index
    %13 = vector.load %arg6[%c0_8, %c0_9, %c0_10] : memref<2x4x256xf32, #tpu.memory_space<vmem>>, vector<2x4x256xf32>
    tpu.vector_store %arg6[%c0_8, %c0_9, %c0_10], %12 {strides = array<i32>} : memref<2x4x256xf32, #tpu.memory_space<vmem>>, vector<2x4x256xf32>,
    return
  }
  func.func @transform_0(%arg0: i32, %arg1: i32) -> (i32, i32, i32) {
    %c0_i32 = arith.constant 0 : i32
    %c0_i32_0 = arith.constant 0 : i32
    return %arg1, %c0_i32, %arg0 : i32, i32, i32
  }
  func.func @transform_1(%arg0: i32, %arg1: i32) -> (i32, i32) {
    %c0_i32 = arith.constant 0 : i32
    %c0_i32_0 = arith.constant 0 : i32
    %c0_i32_1 = arith.constant 0 : i32
    return %c0_i32, %c0_i32_0 : i32, i32
  }
  func.func @transform_2(%arg0: i32, %arg1: i32) -> (i32, i32) {
    %c0_i32 = arith.constant 0 : i32
    %c0_i32_0 = arith.constant 0 : i32
    %c0_i32_1 = arith.constant 0 : i32
    return %c0_i32, %c0_i32_0 : i32, i32
  }
  func.func @transform_3(%arg0: i32, %arg1: i32) -> (i32, i32) {
    %c0_i32 = arith.constant 0 : i32
    %c0_i32_0 = arith.constant 0 : i32
    return %c0_i32, %arg0 : i32, i32
  }
  func.func @transform_4(%arg0: i32, %arg1: i32) -> (i32, i32, i32) {
    %c0_i32 = arith.constant 0 : i32
    %c0_i32_0 = arith.constant 0 : i32
    return %arg1, %c0_i32, %arg0 : i32, i32, i32
  }
}

</mosaic_0001>

<bundles_post_ra>
// kernel: lazy_batchnorm2d.2
= control target key start
LH: loop header
LB: loop body
LE: loop exit
PB: predicated region body
PF: predicated region fallthrough
CT: control target
= control target key end

     0   :  { %vm36_vm0 = vcmask 1043456   ;;  %v47_v22 = vlaneseq  ;;  %vm54_vm1 = vcmask 24576   ;;  %s151_s0 = inlined_call_operand.vmem [shape: f32[2,4,256], index: 0, kind: input, shape index: {}]   ;;  %s152_s1 = inlined_call_operand.vmem [shape: f32[1,1,4], index: 1, kind: output, shape index: {0}]   ;;  %s153_s2 = inlined_call_operand.vmem [shape: f32[1,1,4], index: 2, kind: output, shape index: {1}]  }
   0x1   :  { %v28_v0 = vld [vmem:[%s151_s0] sm:$0xff]  ;;  %v29_v1 = vld [vmem:[%s151_s0 + $0x8] sm:$0xff] }
   0x2   :  { %v32_v2 = vcombine.high %v28_v0, %v28_v0  ;;  %v33_v3 = vcombine.high %v29_v1, %v29_v1  ;;  %v37_v4 = vsel %vm36_vm0, %v28_v0, 0.0  ;;  %v56_v5 = vmul.f32 %v28_v0, %v28_v0 }
   0x3   :  { %v57_v6 = vmul.f32 %v29_v1, %v29_v1  ;;  %v40_v8 = vsel %vm36_vm0, %v29_v1, 0.0  ;;  %v48_v23 = vand.u32 127, %v47_v22  ;;  %v50_v24 = vshrl.u32 %v47_v22, 7 }
   0x4   :  { %v38_v7 = vsel %vm36_vm0, %v32_v2, 0.0  ;;  %v60_v10 = vcombine.high %v56_v5, %v56_v5  ;;  %v64_v12 = vsel %vm36_vm0, %v56_v5, 0.0  ;;  %v42_v13 = vsel %vm36_vm0, %v33_v3, 0.0 }
   0x5   :  { %v39_v9 = vadd.f32 %v38_v7, %v37_v4  ;;  %v61_v11 = vcombine.high %v57_v6, %v57_v6  ;;  %v67_v16 = vsel %vm36_vm0, %v57_v6, 0.0  ;;  %v51_v25 = vsub.s32 %v48_v23, %v50_v24 }
   0x6   :  { %v65_v15 = vsel %vm36_vm0, %v60_v10, 0.0 }
   0x7   :  { %v41_v14 = vadd.f32 %v40_v8, %v39_v9  ;;  %v66_v17 = vadd.f32 %v65_v15, %v64_v12  ;;  %v69_v19 = vsel %vm36_vm0, %v61_v11, 0.0 }
   0x9   :  { %v43_v18 = vadd.f32 %v42_v13, %v41_v14  ;;  %v68_v20 = vadd.f32 %v67_v16, %v66_v17 }
   0xb   :  { %44 = vadd.xlane.f32.xlu0 %v43_v18  ;;  %v70_v21 = vadd.f32 %v69_v19, %v68_v20 }
   0xf   :  { %71 = vadd.xlane.f32.xlu0 %v70_v21 }
  0x98   :  { %v45_v26 = vpop.xlane.xlu0 %44 }
  0x99   :  { %v52_v27 = vrot.slane %v45_v26, %v51_v25 }
  0x9b   :  { %55 = vst.msk [vmem:[%s152_s1] sm:$0x1] %vm54_vm1, %v52_v27 }
  0x9c   :  { %v72_v28 = vpop.xlane.xlu0 %71 }
  0x9d   :  { %v77_v29 = vrot.slane %v72_v28, %v51_v25 }
  0x9f   :  { %79 = vst.msk [vmem:[%s153_s2] sm:$0x1] %vm54_vm1, %v77_v29 }

// kernel: lazy_batchnorm2d.3
= control target key start
LH: loop header
LB: loop body
LE: loop exit
PB: predicated region body
PF: predicated region fallthrough
CT: control target
= control target key end

     0   :  { %v60_v0 = vmov 0   ;;  %v61_v3 = vmov 839922192   ;;  %v29_v5 = vlaneseq  ;;  %s108_s2 = inlined_call_operand.vmem [shape: f32[4,1], index: 2, kind: input, shape index: {}]   ;;  %s109_s1 = inlined_call_operand.vmem [shape: f32[4,1], index: 1, kind: input, shape index: {}]   ;;  %s110_s3 = inlined_call_operand.vmem [shape: f32[4,256], index: 3, kind: input, shape index: {}]   ;;  %s111_s0 = inlined_call_operand.vmem [shape: f32[2,4,256], index: 0, kind: input, shape index: {}]   ;;  %s112_s4 = inlined_call_operand.vmem [shape: f32[2,4,256], index: 4, kind: output, shape index: {}]  }
   0x1   :  { %59 = vset.pattern.permute.xlu0 %v60_v0  ;;  %v20_v1 = vld [vmem:[%s108_s2] sm:$0xf]  ;;  %v27_v4 = vunpack.c.l.s4 %v61_v3  ;;  %v18_v14 = vld [vmem:[%s111_s0 + $0x8] sm:$0xff] }
   0x2   :  { %24 = vperm.xlu0 %59, %v20_v1   ;;  %v19_v2 = vld [vmem:[%s109_s1] sm:$0xf]  ;;  %v30_v7 = vshrl.u32 %v29_v5, 7 }
   0x3   :  { %v28_v6 = vunpack.c.0.s8 %v27_v4  ;;  %v21_v11 = vld [vmem:[%s110_s3] sm:$0xff] }
   0x4   :  { %v17_v13 = vld [vmem:[%s111_s0] sm:$0xff] }
   0x5   :  { %v31_v8 = vsub.s32 %v28_v6, %v30_v7 }
   0x6   :  { %37 = vperm.xlu0 %59, %v19_v2  }
  0x81   :  { %v25_v9 = vpop.permute.xlu0 %24 }
  0x82   :  { %v32_v10 = vrot.slane %v25_v9, %v31_v8 }
  0x84   :  { %v34_v16 = vadd.f32 %v32_v10, %v21_v11 }
  0x85   :  { %v38_v12 = vpop.permute.xlu0 %37 }
  0x86   :  { %v45_v15 = vrot.slane %v38_v12, %v31_v8 }
  0x88   :  { %v47_v17 = vmul.f32 %v45_v15, %v17_v13  ;;  %v48_v18 = vmul.f32 %v45_v15, %v18_v14 }
  0x8a   :  { %v49_v19 = vadd.f32 %v47_v17, %v34_v16  ;;  %v50_v20 = vadd.f32 %v48_v18, %v34_v16 }
  0x8c   :  { %51 = vst [vmem:[%s112_s4] sm:$0xff] %v49_v19  ;;  %52 = vst [vmem:[%s112_s4 + $0x8] sm:$0xff] %v50_v20 }

</bundles_post_ra>
